<compile_context>
chip_gen: v5e
topology: v5e:2x2
jax: 0.10.0
libtpu: 0.0.40
codegen_flags: <defaults>
</compile_context>

<pallas_src>
import math
import jax
import jax.numpy as jnp
from jax.experimental import pallas as pl
from jax.experimental.pallas import tpu as pltpu


def _feature_regression_kernel(x_ref, w_ref, b_ref, o_ref):
    """o = x @ W_eff + b  (W_eff already masked & transposed in the wrapper).

    x_ref: (TB, Dp) VMEM
    w_ref: (Dp, Dp) VMEM (resident across batch tiles)
    b_ref: (1,  Dp) VMEM (resident across batch tiles)
    o_ref: (TB, Dp) VMEM
    """
    acc = jnp.dot(x_ref[...], w_ref[...], preferred_element_type=jnp.float32)
    o_ref[...] = (acc + b_ref[...]).astype(o_ref.dtype)


def _round_up(n, m):
    return ((n + m - 1) // m) * m


def feature_regression(x, W, b, *, max_tile_rows=512):
    """Pallas wrapper. x: (B, D), W: (D, D), b: (D,) -> (B, D).

    Matches PyTorch:  z_h = F.linear(x, W * (1 - eye(D)), b)
    """
    B, D = x.shape
    assert W.shape == (D, D)
    assert b.shape == (D,)
    dtype = x.dtype

    # --- hoist the mask + transpose out of the kernel (paid once in XLA) ---
    mask = 1.0 - jnp.eye(D, dtype=W.dtype)
    W_eff = (W * mask).T  # (D, D): x @ W_eff == x @ (W*m).T

    # --- pad feature (lane) axis to a multiple of 128 for lane-dense stores ---
    Dp = _round_up(D, 128)
    # --- pad / tile the batch (sublane) axis ---
    Bp = _round_up(B, 8)
    TB = min(max_tile_rows, Bp)          # multiple of 8 by construction
    Bp = _round_up(Bp, TB)               # grid divides evenly

    x_p = jnp.zeros((Bp, Dp), dtype).at[:B, :D].set(x)
    w_p = jnp.zeros((Dp, Dp), dtype).at[:D, :D].set(W_eff.astype(dtype))
    b_p = jnp.zeros((1, Dp), dtype).at[0, :D].set(b.astype(dtype))

    grid = (Bp // TB,)

    out_p = pl.pallas_call(
        _feature_regression_kernel,
        out_shape=jax.ShapeDtypeStruct((Bp, Dp), dtype),
        grid=grid,
        in_specs=[
            pl.BlockSpec((TB, Dp), lambda i: (i, 0)),   # x: batch-tiled
            pl.BlockSpec((Dp, Dp), lambda i: (0, 0)),   # W_eff: VMEM-resident
            pl.BlockSpec((1, Dp), lambda i: (0, 0)),    # b:     VMEM-resident
        ],
        out_specs=pl.BlockSpec((TB, Dp), lambda i: (i, 0)),
        compiler_params=pltpu.CompilerParams(
            dimension_semantics=("parallel",),
        ),
    )(x_p, w_p, b_p)

    return out_p[:B, :D]


def feature_regression_ref(x, W, b):
    """Pure-JAX reference matching the PyTorch forward."""
    D = W.shape[0]
    m = jnp.ones((D, D), x.dtype) - jnp.eye(D, dtype=x.dtype)
    return x @ (W * m).T + b


if __name__ == "__main__":
    B = 8      # batch
    D = 32     # input_size (feature dimension)

    key = jax.random.PRNGKey(0)
    kx, kw, kb = jax.random.split(key, 3)

    # Deterministic parameter init matching reset_parameters():
    # uniform(-stdv, stdv) with stdv = 1/sqrt(input_size)
    stdv = 1.0 / math.sqrt(D)
    W = jax.random.uniform(kw, (D, D), jnp.float32, minval=-stdv, maxval=stdv)
    b = jax.random.uniform(kb, (D,), jnp.float32, minval=-stdv, maxval=stdv)

    x = jax.random.normal(kx, (B, D), jnp.float32)

    out = feature_regression(x, W, b)
    out = jax.block_until_ready(out)

    ref = feature_regression_ref(x, W, b)
    assert out.shape == (B, D)
    assert jnp.allclose(out, ref, atol=1e-5, rtol=1e-5), "mismatch vs reference"

    print("KERNEL_OK")
</pallas_src>

<mosaic_0001>
module attributes {stable_mosaic.version = 11 : i64} {
  func.func @_feature_regression_kernel(%arg0: i32, %arg1: memref<8x128xf32, #tpu.memory_space<vmem>>, %arg2: memref<128x128xf32, #tpu.memory_space<vmem>>, %arg3: memref<1x128xf32, #tpu.memory_space<vmem>>, %arg4: memref<8x128xf32, #tpu.memory_space<vmem>>) attributes {dimension_semantics = [#tpu.dimension_semantics<parallel>], iteration_bounds = array<i64: 1>, scalar_prefetch = 0 : i64, scratch_operands = 0 : i64, tpu.core_type = #tpu.core_type<tc>, window_params = [{transform_indices = @transform_0, window_bounds = array<i64: 8, 128>}, {pipeline_mode = #tpu.pipeline_mode<synchronous>, transform_indices = @transform_1, window_bounds = array<i64: 128, 128>}, {pipeline_mode = #tpu.pipeline_mode<synchronous>, transform_indices = @transform_2, window_bounds = array<i64: 1, 128>}, {transform_indices = @transform_3, window_bounds = array<i64: 8, 128>}]} {
    %c0 = arith.constant 0 : index
    %c0_0 = arith.constant 0 : index
    %0 = vector.load %arg1[%c0, %c0_0] : memref<8x128xf32, #tpu.memory_space<vmem>>, vector<8x128xf32>
    %c0_1 = arith.constant 0 : index
    %c0_2 = arith.constant 0 : index
    %1 = vector.load %arg2[%c0_1, %c0_2] : memref<128x128xf32, #tpu.memory_space<vmem>>, vector<128x128xf32>
    %cst = arith.constant dense<0.000000e+00> : vector<8x128xf32>
    %2 = tpu.matmul %0, %1, %cst {dimension_numbers = #tpu.dot_dimension_numbers<[1], [0], [0], [1], [0, 0, 1, 1], [], []>} : vector<8x128xf32>, vector<128x128xf32>, vector<8x128xf32> -> vector<8x128xf32>
    %c0_3 = arith.constant 0 : index
    %c0_4 = arith.constant 0 : index
    %3 = vector.load %arg3[%c0_3, %c0_4] : memref<1x128xf32, #tpu.memory_space<vmem>>, vector<1x128xf32>
    %4 = vector.broadcast %3 : vector<1x128xf32> to vector<8x128xf32>
    %5 = arith.addf %2, %4 : vector<8x128xf32>
    %c0_5 = arith.constant 0 : index
    %c0_6 = arith.constant 0 : index
    %6 = vector.load %arg4[%c0_5, %c0_6] : memref<8x128xf32, #tpu.memory_space<vmem>>, vector<8x128xf32>
    tpu.vector_store %arg4[%c0_5, %c0_6], %5 {strides = array<i32>} : memref<8x128xf32, #tpu.memory_space<vmem>>, vector<8x128xf32>,
    return
  }
  func.func @transform_0(%arg0: i32) -> (i32, i32) {
    %c0_i32 = arith.constant 0 : i32
    %c0_i32_0 = arith.constant 0 : i32
    return %arg0, %c0_i32 : i32, i32
  }
  func.func @transform_1(%arg0: i32) -> (i32, i32) {
    %c0_i32 = arith.constant 0 : i32
    %c0_i32_0 = arith.constant 0 : i32
    %c0_i32_1 = arith.constant 0 : i32
    return %c0_i32, %c0_i32_0 : i32, i32
  }
  func.func @transform_2(%arg0: i32) -> (i32, i32) {
    %c0_i32 = arith.constant 0 : i32
    %c0_i32_0 = arith.constant 0 : i32
    %c0_i32_1 = arith.constant 0 : i32
    return %c0_i32, %c0_i32_0 : i32, i32
  }
  func.func @transform_3(%arg0: i32) -> (i32, i32) {
    %c0_i32 = arith.constant 0 : i32
    %c0_i32_0 = arith.constant 0 : i32
    return %arg0, %c0_i32 : i32, i32
  }
}

</mosaic_0001>

<bundles_post_ra>
// kernel: tpu_custom_call.1
= control target key start
LH: loop header
LB: loop body
LE: loop exit
PB: predicated region body
PF: predicated region fallthrough
CT: control target
= control target key end

     0   :  { %8 = vsyncpa [#allocation3], 0  ;;  %s226_s0 = inlined_call_operand.hbm [shape: f32[8,128], index: 0, kind: input, shape index: {}]   ;;  %s227_s1 = inlined_call_operand.hbm [shape: f32[128,128], index: 1, kind: input, shape index: {}]   ;;  %s228_s2 = inlined_call_operand.vmem [shape: f32[1,128], index: 2, kind: input, shape index: {}]   ;;  %s229_s3 = inlined_call_operand.hbm [shape: f32[8,128], index: 3, kind: output, shape index: {}]  }
   0x1   :  { %9 = vsyncpa [#allocation6], 0 }
   0x2   :  { %10 = vsyncpa [#allocation4], 0  ;;  %s16_s14 = sshll.u32 %s226_s0, 4  ;;  %s189_s15 = smov [#allocation2]   ;;  %s17_s14 = int_to_ptr.hbm [resolvable:$true] %s16_s14 }
   0x3   :  { %s18_s16 = sshll.u32 %s189_s15, 4  ;;  %s26_s19 = sshll.u32 %s227_s1, 4  ;;  %s19_s16 = int_to_ptr.vmem [resolvable:$true] %s18_s16  ;;  %s27_s19 = int_to_ptr.hbm [resolvable:$true] %s26_s19 }
   0x4   :  { %21 = dma.hbm_to_vmem [thread:$0]  %s17_s14, 128, %s19_s16, [#allocation3]  }
   0x5   :  { %s190_s20 = smov [#allocation5]   ;;  %s191_s22 = smov 128  }
   0x6   :  { %s28_s21 = sshll.u32 %s190_s20, 4  ;;  %s192_s23 = smov 8   ;;  %s29_s21 = int_to_ptr.vmem [resolvable:$true] %s28_s21 }
   0x7   :  { %34 = dma.hbm_to_vmem [thread:$0]  %s27_s19, 2048, %s29_s21, [#allocation6], %s191_s22, %s191_s22, %s192_s23  }
   0x8   :  { %183 = dma.done.wait [#allocation3], 128  }
   0x9   :  { %184 = vsyncadd [#allocation3], 4294967168 }
   0xa   :  { %185 = dma.done.wait [#allocation6], 2048  }
   0xb   :  { %186 = vsyncadd [#allocation6], 4294965248  ;;  %v61_v0 = vld [vmem:[#allocation5 + $0x78] sm:$0xff]  ;;  %v60_v1 = vld [vmem:[#allocation5 + $0x70] sm:$0xff]  ;;  %s193_s24 = smov [#allocation7]   ;;  %s94_s28 = sshll.u32 %s229_s3, 4  ;;  %s95_s28 = int_to_ptr.hbm [resolvable:$true] %s94_s28 }
   0xc   :  { %66 = vmatpush.msra.mxu0 %v61_v0  ;;  %v59_v2 = vld [vmem:[#allocation5 + $0x68] sm:$0xff]  ;;  %v58_v3 = vld [vmem:[#allocation5 + $0x60] sm:$0xff]  ;;  %v57_v4 = vld [vmem:[#allocation5 + $0x58] sm:$0xff]  ;;  %s92_s25 = sshll.u32 %s193_s24, 4  ;;  %s93_s25 = int_to_ptr.vmem [resolvable:$true] %s92_s25 }
   0xd   :  { %v56_v5 = vld [vmem:[#allocation5 + $0x50] sm:$0xff]  ;;  %v55_v6 = vld [vmem:[#allocation5 + $0x48] sm:$0xff]  ;;  %v54_v7 = vld [vmem:[#allocation5 + $0x40] sm:$0xff] }
   0xe   :  { %67 = vmatpush.msra.mxu0 %v60_v1  ;;  %v53_v8 = vld [vmem:[#allocation5 + $0x38] sm:$0xff]  ;;  %v52_v9 = vld [vmem:[#allocation5 + $0x30] sm:$0xff]  ;;  %v51_v10 = vld [vmem:[#allocation5 + $0x28] sm:$0xff] }
   0xf   :  { %v50_v11 = vld [vmem:[#allocation5 + $0x20] sm:$0xff]  ;;  %v49_v12 = vld [vmem:[#allocation5 + $0x18] sm:$0xff]  ;;  %v48_v13 = vld [vmem:[#allocation5 + $0x10] sm:$0xff] }
  0x10   :  { %68 = vmatpush.msra.mxu0 %v59_v2  ;;  %v47_v14 = vld [vmem:[#allocation5 + $0x8] sm:$0xff]  ;;  %v46_v15 = vld [vmem:[#allocation5] sm:$0xff]  ;;  %v45_v16 = vld [vmem:[#allocation2] sm:$0xff] }
  0x11   :  { %v110_v17 = vld [vmem:[%s228_s2] ss:$0 sm:$0xff] }
  0x12   :  { %69 = vmatpush.msra.mxu0 %v58_v3 }
  0x14   :  { %70 = vmatpush.msra.mxu0 %v57_v4 }
  0x16   :  { %71 = vmatpush.msra.mxu0 %v56_v5 }
  0x18   :  { %72 = vmatpush.msra.mxu0 %v55_v6 }
  0x1a   :  { %73 = vmatpush.msra.mxu0 %v54_v7 }
  0x1c   :  { %74 = vmatpush.msra.mxu0 %v53_v8 }
  0x1e   :  { %75 = vmatpush.msra.mxu0 %v52_v9 }
  0x20   :  { %76 = vmatpush.msra.mxu0 %v51_v10 }
  0x22   :  { %77 = vmatpush.msra.mxu0 %v50_v11 }
  0x24   :  { %78 = vmatpush.msra.mxu0 %v49_v12 }
  0x26   :  { %79 = vmatpush.msra.mxu0 %v48_v13 }
  0x28   :  { %80 = vmatpush.msra.mxu0 %v47_v14 }
  0x2a   :  { %81 = vmatpush.msra.mxu0 %v46_v15 }
  0x2b   :  { %82 = vmatmul.f32.vlgmr.msra.gmra.mxu0 %v45_v16 }
  0xa8   :  { %v83_v18 = vpop.f32.mrf.mxu0 }
  0xa9   :  { %v84_v19 = vadd.f32 %v110_v17, %v83_v18 }
  0xab   :  { %86 = vst [vmem:[#allocation7] sm:$0xff] %v84_v19 }
  0xac   :  { %97 = dma.vmem_to_hbm [thread:$0]  %s93_s25, 128, %s95_s28, [#allocation4]  }
  0xad   :  { %187 = dma.done.wait [#allocation4], 128  }
  0xae   :  { %188 = vsyncadd [#allocation4], 4294967168 }
  0xaf   :  { %102 = vsyncpa [#allocation3], 1 }
  0xb0   :  { %103 = vsyncpa [#allocation6], 1 }
  0xb1   :  { %104 = vsyncpa [#allocation4], 1 }

</bundles_post_ra>
